<compile_context>
chip_gen: v6e
topology: v6e:2x2x1
jax: 0.10.0
libtpu: 0.0.40
codegen_flags: <defaults>
</compile_context>

<pallas_src>
import functools

import jax
import jax.numpy as jnp
from jax.experimental import pallas as pl
from jax.experimental.pallas import tpu as pltpu


def _round_up(n, k):
    return ((n + k - 1) // k) * k


@functools.lru_cache(maxsize=1)
def _device_vmem_bytes():
    """Per-core VMEM capacity; conservative 64 MiB fallback (v7x per-TC)."""
    try:
        return int(pltpu.get_tpu_info().vmem_capacity_bytes)
    except Exception:
        return 64 << 20


def _vmem_usage_bytes(tm, tf, dmp, it_mm, it_x, it_out):
    resident = tm * dmp * 4                       # fp32 accumulator scratch
    streams = 2 * (tm * dmp * it_x                # x tile (double-buffered)
                   + tm * dmp * it_out            # out tile
                   + dmp * tf * it_mm             # W1 slab
                   + tf * 4                       # b1 slab
                   + tf * dmp * it_mm             # W2 slab
                   + dmp * 4)                     # b2
    temp = tm * tf * 4                            # fp32 hidden chunk
    return resident + streams + temp


def _ffn_kernel(x_ref, w1_ref, b1_ref, w2_ref, b2_ref, o_ref, acc_ref, *, mm_dtype):
    k = pl.program_id(1)

    @pl.when(k == 0)
    def _init():
        acc_ref[...] = jnp.zeros_like(acc_ref)

    # Cast the activation tile on the VPU (free filler under the MXU) rather
    # than paying a separate wrapper-side XLA cast pass over all of x.
    x = x_ref[...].astype(mm_dtype)
    # h_k = relu(x @ W1_slab + b1_slab): MXU matmul, fp32 accumulation,
    # fp32 bias-add + ReLU on the VPU (v5e has no bf16 VPU).
    h = jnp.dot(x, w1_ref[...], preferred_element_type=jnp.float32)
    h = jnp.maximum(h + b1_ref[...], 0.0)
    # TODO(synk): dropout is eval-mode identity here; training-mode dropout
    # would need pltpu.prng_seed/prng_random_bits with grid-invariant seeding.
    acc_ref[...] += jnp.dot(h.astype(mm_dtype), w2_ref[...],
                            preferred_element_type=jnp.float32)

    @pl.when(k == pl.num_programs(1) - 1)
    def _store():
        o_ref[...] = (acc_ref[...] + b2_ref[...]).astype(o_ref.dtype)


def prepare_params(w1, b1, w2, b2, *, matmul_dtype=jnp.bfloat16, tile_f=512):
    """Pad + cast the weights ONCE (hoisted out of the per-call HBM path).

    w1: (d_model, dim_ff), b1: (dim_ff,), w2: (dim_ff, d_model), b2: (d_model,)
    (weights stored transposed vs torch: we compute x @ W).
    Zero padding is exact (padded hidden columns stay 0 through ReLU and padded
    W2 rows contribute 0). Biases stay fp32.
    """
    d_model, dim_ff = w1.shape
    mm_dtype = jnp.dtype(matmul_dtype)
    dmp = _round_up(d_model, 128)
    tf = min(_round_up(tile_f, 128), _round_up(dim_ff, 128))
    ffp = _round_up(dim_ff, tf)
    w1p = jnp.pad(w1, ((0, dmp - d_model), (0, ffp - dim_ff))).astype(mm_dtype)
    w2p = jnp.pad(w2, ((0, ffp - dim_ff), (0, dmp - d_model))).astype(mm_dtype)
    b1p = jnp.pad(b1, (0, ffp - dim_ff)).astype(jnp.float32).reshape(1, ffp)
    b2p = jnp.pad(b2, (0, dmp - d_model)).astype(jnp.float32).reshape(1, dmp)
    return w1p, b1p, w2p, b2p


@functools.partial(jax.jit, static_argnames=("tile_m", "tile_f"))
def ffn_apply(x, w1p, b1p, w2p, b2p, *, tile_m=512, tile_f=512):
    """x: (batch, seq, d_model); weights from prepare_params (same tile_f)."""
    orig_dtype = x.dtype
    batch, seq, d_model = x.shape
    m = batch * seq
    dmp, ffp = w1p.shape
    mm_dtype = jnp.dtype(w1p.dtype)
    it_mm = mm_dtype.itemsize
    it_x = jnp.dtype(orig_dtype).itemsize
    it_out = it_x

    # dim_ff slab size: must match prepare_params (same tile_f => same tf).
    tf = min(_round_up(tile_f, 128), ffp)
    assert ffp % tf == 0, "tile_f must match the value used in prepare_params"

    # Row tile: large to amortize per-step overhead and MXU weight pushes,
    # shrunk for small inputs and to fit the per-core VMEM budget.
    sublane = 16 if it_mm == 2 else 8
    tm = _round_up(min(tile_m, _round_up(m, sublane)), sublane)
    vmem_cap = _device_vmem_bytes()
    budget = vmem_cap - (8 << 20)
    while tm > sublane and _vmem_usage_bytes(tm, tf, dmp, it_mm, it_x, it_out) > budget:
        tm = max(sublane, _round_up(tm // 2, sublane))
    mp = _round_up(m, tm)

    x2d = x.reshape(m, d_model)
    if mp != m or dmp != d_model:
        x2d = jnp.pad(x2d, ((0, mp - m), (0, dmp - d_model)))

    usage = _vmem_usage_bytes(tm, tf, dmp, it_mm, it_x, it_out)
    vmem_limit = int(min(max(int(1.3 * usage) + (4 << 20), 16 << 20),
                         vmem_cap - (2 << 20)))

    n_row = mp // tm
    n_k = ffp // tf
    flops = 4 * mp * dmp * ffp  # two matmuls, 2*M*K*N each
    bytes_accessed = (mp * dmp * it_x
                      + n_row * (dmp * ffp + ffp * dmp) * it_mm
                      + ffp * 4 + dmp * 4
                      + mp * dmp * it_out)

    out2d = pl.pallas_call(
        functools.partial(_ffn_kernel, mm_dtype=mm_dtype),
        out_shape=jax.ShapeDtypeStruct((mp, dmp), orig_dtype),
        grid_spec=pltpu.PrefetchScalarGridSpec(
            num_scalar_prefetch=0,
            grid=(n_row, n_k),
            in_specs=[
                # x tile: constant across k => fetched once per row tile.
                pl.BlockSpec((tm, dmp), lambda i, k: (i, 0)),
                # W1 / b1 / W2 slabs streamed along the dim_ff axis.
                pl.BlockSpec((dmp, tf), lambda i, k: (0, k)),
                pl.BlockSpec((1, tf), lambda i, k: (0, k)),
                pl.BlockSpec((tf, dmp), lambda i, k: (k, 0)),
                # b2: tiny, constant index.
                pl.BlockSpec((1, dmp), lambda i, k: (0, 0)),
            ],
            out_specs=pl.BlockSpec((tm, dmp), lambda i, k: (i, 0)),
            scratch_shapes=[pltpu.VMEM((tm, dmp), jnp.float32)],
        ),
        compiler_params=pltpu.CompilerParams(
            dimension_semantics=("parallel", "arbitrary"),
            vmem_limit_bytes=vmem_limit,
        ),
        cost_estimate=pl.CostEstimate(
            flops=flops, transcendentals=0, bytes_accessed=bytes_accessed),
    )(x2d, w1p, b1p, w2p, b2p)

    return out2d[:m, :d_model].reshape(batch, seq, d_model)


def positionwise_feedforward(x, w1, b1, w2, b2, *, matmul_dtype=jnp.bfloat16,
                             tile_m=512, tile_f=512):
    """One-shot convenience wrapper (re-pads weights each call). For repeated
    forwards, call prepare_params once and ffn_apply per step."""
    params = prepare_params(w1, b1, w2, b2, matmul_dtype=matmul_dtype, tile_f=tile_f)
    return ffn_apply(x, *params, tile_m=tile_m, tile_f=tile_f)


def init_params(key, d_model, dim_ff):
    """Deterministic init matching nn.Linear defaults: U(-1/sqrt(fan_in), 1/sqrt(fan_in))."""
    k1, k2, k3, k4 = jax.random.split(key, 4)
    bound1 = 1.0 / (d_model ** 0.5)
    bound2 = 1.0 / (dim_ff ** 0.5)
    # Stored transposed relative to torch (we compute x @ W, torch does x @ W.T).
    w1 = jax.random.uniform(k1, (d_model, dim_ff), jnp.float32, -bound1, bound1)
    b1 = jax.random.uniform(k2, (dim_ff,), jnp.float32, -bound1, bound1)
    w2 = jax.random.uniform(k3, (dim_ff, d_model), jnp.float32, -bound2, bound2)
    b2 = jax.random.uniform(k4, (d_model,), jnp.float32, -bound2, bound2)
    return w1, b1, w2, b2


if __name__ == "__main__":
    key = jax.random.PRNGKey(0)
    # dim_ff=320 with tile_f=128 exercises the dim_ff reduction axis (3 slabs,
    # last one zero-padded 320->384).
    batch, seq, d_model, dim_ff = 2, 8, 32, 320

    kx, kp = jax.random.split(key)
    x = jax.random.normal(kx, (batch, seq, d_model), jnp.float32)
    w1, b1, w2, b2 = init_params(kp, d_model, dim_ff)

    # Pure-JAX reference (dropout is identity in eval mode).
    ref = jnp.maximum(x @ w1 + b1, 0.0) @ w2 + b2

    # fp32-operand path (tight check), multi-slab accumulation.
    p32 = prepare_params(w1, b1, w2, b2, matmul_dtype=jnp.float32, tile_f=128)
    out32 = jax.block_until_ready(ffn_apply(x, *p32, tile_f=128))
    assert out32.shape == (batch, seq, d_model)
    assert jnp.allclose(out32, ref, atol=1e-4, rtol=1e-4)

    # Default bf16-operand path (v6e/v7x MXU rate), fp32 accumulation.
    pbf = prepare_params(w1, b1, w2, b2)
    outbf = jax.block_until_ready(ffn_apply(x, *pbf))
    assert outbf.shape == (batch, seq, d_model)
    assert jnp.allclose(outbf, ref, atol=5e-2, rtol=5e-2)

    # One-shot convenience wrapper.
    out_conv = jax.block_until_ready(positionwise_feedforward(x, w1, b1, w2, b2))
    assert jnp.allclose(out_conv, ref, atol=5e-2, rtol=5e-2)

    print("KERNEL_OK")
</pallas_src>

<mosaic_0001>
module attributes {stable_mosaic.version = 11 : i64} {
  func.func @_ffn_kernel(%arg0: i32, %arg1: i32, %arg2: memref<16x128xf32, #tpu.memory_space<vmem>>, %arg3: memref<128x128xf32, #tpu.memory_space<vmem>>, %arg4: memref<1x128xf32, #tpu.memory_space<vmem>>, %arg5: memref<128x128xf32, #tpu.memory_space<vmem>>, %arg6: memref<1x128xf32, #tpu.memory_space<vmem>>, %arg7: memref<16x128xf32, #tpu.memory_space<vmem>>, %arg8: memref<16x128xf32, #tpu.memory_space<vmem>>) attributes {dimension_semantics = [#tpu.dimension_semantics<parallel>, #tpu.dimension_semantics<arbitrary>], iteration_bounds = array<i64: 1, 3>, scalar_prefetch = 0 : i64, scratch_operands = 1 : i64, tpu.core_type = #tpu.core_type<tc>, window_params = [{transform_indices = @transform_0, window_bounds = array<i64: 16, 128>}, {transform_indices = @transform_1, window_bounds = array<i64: 128, 128>}, {transform_indices = @transform_2, window_bounds = array<i64: 1, 128>}, {transform_indices = @transform_3, window_bounds = array<i64: 128, 128>}, {pipeline_mode = #tpu.pipeline_mode<synchronous>, transform_indices = @transform_4, window_bounds = array<i64: 1, 128>}, {transform_indices = @transform_5, window_bounds = array<i64: 16, 128>}]} {
    %c0_i32 = arith.constant 0 : i32
    %0 = arith.cmpi eq, %arg1, %c0_i32 : i32
    %1 = arith.extui %0 : i1 to i32
    %c0_i32_0 = arith.constant 0 : i32
    %2 = arith.cmpi ne, %1, %c0_i32_0 : i32
    scf.if %2 {
      %cst_15 = arith.constant 0.000000e+00 : f32
      %19 = vector.broadcast %cst_15 : f32 to vector<16x128xf32>
      %c0_16 = arith.constant 0 : index
      %c0_17 = arith.constant 0 : index
      %20 = vector.load %arg8[%c0_16, %c0_17] : memref<16x128xf32, #tpu.memory_space<vmem>>, vector<16x128xf32>
      tpu.vector_store %arg8[%c0_16, %c0_17], %19 {strides = array<i32>} : memref<16x128xf32, #tpu.memory_space<vmem>>, vector<16x128xf32>,
    } else {
    }
    %c0 = arith.constant 0 : index
    %c0_1 = arith.constant 0 : index
    %3 = vector.load %arg2[%c0, %c0_1] : memref<16x128xf32, #tpu.memory_space<vmem>>, vector<16x128xf32>
    %c0_2 = arith.constant 0 : index
    %c0_3 = arith.constant 0 : index
    %4 = vector.load %arg3[%c0_2, %c0_3] : memref<128x128xf32, #tpu.memory_space<vmem>>, vector<128x128xf32>
    %cst = arith.constant dense<0.000000e+00> : vector<16x128xf32>
    %5 = tpu.matmul %3, %4, %cst {dimension_numbers = #tpu.dot_dimension_numbers<[1], [0], [0], [1], [0, 0, 1, 1], [], []>} : vector<16x128xf32>, vector<128x128xf32>, vector<16x128xf32> -> vector<16x128xf32>
    %c0_4 = arith.constant 0 : index
    %c0_5 = arith.constant 0 : index
    %6 = vector.load %arg4[%c0_4, %c0_5] : memref<1x128xf32, #tpu.memory_space<vmem>>, vector<1x128xf32>
    %7 = vector.broadcast %6 : vector<1x128xf32> to vector<16x128xf32>
    %8 = arith.addf %5, %7 : vector<16x128xf32>
    %cst_6 = arith.constant 0.000000e+00 : f32
    %9 = vector.broadcast %cst_6 : f32 to vector<16x128xf32>
    %10 = arith.maximumf %8, %9 : vector<16x128xf32>
    %c0_7 = arith.constant 0 : index
    %c0_8 = arith.constant 0 : index
    %11 = vector.load %arg8[%c0_7, %c0_8] : memref<16x128xf32, #tpu.memory_space<vmem>>, vector<16x128xf32>
    %c0_9 = arith.constant 0 : index
    %c0_10 = arith.constant 0 : index
    %12 = vector.load %arg5[%c0_9, %c0_10] : memref<128x128xf32, #tpu.memory_space<vmem>>, vector<128x128xf32>
    %cst_11 = arith.constant dense<0.000000e+00> : vector<16x128xf32>
    %13 = tpu.matmul %10, %12, %cst_11 {dimension_numbers = #tpu.dot_dimension_numbers<[1], [0], [0], [1], [0, 0, 1, 1], [], []>} : vector<16x128xf32>, vector<128x128xf32>, vector<16x128xf32> -> vector<16x128xf32>
    %14 = arith.addf %11, %13 : vector<16x128xf32>
    %c0_12 = arith.constant 0 : index
    %c0_13 = arith.constant 0 : index
    %15 = vector.load %arg8[%c0_12, %c0_13] : memref<16x128xf32, #tpu.memory_space<vmem>>, vector<16x128xf32>
    tpu.vector_store %arg8[%c0_12, %c0_13], %14 {strides = array<i32>} : memref<16x128xf32, #tpu.memory_space<vmem>>, vector<16x128xf32>,
    %c2_i32 = arith.constant 2 : i32
    %16 = arith.cmpi eq, %arg1, %c2_i32 : i32
    %17 = arith.extui %16 : i1 to i32
    %c0_i32_14 = arith.constant 0 : i32
    %18 = arith.cmpi ne, %17, %c0_i32_14 : i32
    scf.if %18 {
      %c0_15 = arith.constant 0 : index
      %c0_16 = arith.constant 0 : index
      %19 = vector.load %arg8[%c0_15, %c0_16] : memref<16x128xf32, #tpu.memory_space<vmem>>, vector<16x128xf32>
      %c0_17 = arith.constant 0 : index
      %c0_18 = arith.constant 0 : index
      %20 = vector.load %arg6[%c0_17, %c0_18] : memref<1x128xf32, #tpu.memory_space<vmem>>, vector<1x128xf32>
      %21 = vector.broadcast %20 : vector<1x128xf32> to vector<16x128xf32>
      %22 = arith.addf %19, %21 : vector<16x128xf32>
      %c0_19 = arith.constant 0 : index
      %c0_20 = arith.constant 0 : index
      %23 = vector.load %arg7[%c0_19, %c0_20] : memref<16x128xf32, #tpu.memory_space<vmem>>, vector<16x128xf32>
      tpu.vector_store %arg7[%c0_19, %c0_20], %22 {strides = array<i32>} : memref<16x128xf32, #tpu.memory_space<vmem>>, vector<16x128xf32>,
    } else {
    }
    return
  }
  func.func @transform_0(%arg0: i32, %arg1: i32) -> (i32, i32) {
    %c0_i32 = arith.constant 0 : i32
    %c0_i32_0 = arith.constant 0 : i32
    return %arg0, %c0_i32 : i32, i32
  }
  func.func @transform_1(%arg0: i32, %arg1: i32) -> (i32, i32) {
    %c0_i32 = arith.constant 0 : i32
    %c0_i32_0 = arith.constant 0 : i32
    return %c0_i32, %arg1 : i32, i32
  }
  func.func @transform_2(%arg0: i32, %arg1: i32) -> (i32, i32) {
    %c0_i32 = arith.constant 0 : i32
    %c0_i32_0 = arith.constant 0 : i32
    return %c0_i32, %arg1 : i32, i32
  }
  func.func @transform_3(%arg0: i32, %arg1: i32) -> (i32, i32) {
    %c0_i32 = arith.constant 0 : i32
    %c0_i32_0 = arith.constant 0 : i32
    return %arg1, %c0_i32 : i32, i32
  }
  func.func @transform_4(%arg0: i32, %arg1: i32) -> (i32, i32) {
    %c0_i32 = arith.constant 0 : i32
    %c0_i32_0 = arith.constant 0 : i32
    %c0_i32_1 = arith.constant 0 : i32
    return %c0_i32, %c0_i32_0 : i32, i32
  }
  func.func @transform_5(%arg0: i32, %arg1: i32) -> (i32, i32) {
    %c0_i32 = arith.constant 0 : i32
    %c0_i32_0 = arith.constant 0 : i32
    return %arg0, %c0_i32 : i32, i32
  }
}

</mosaic_0001>

<bundles_post_ra>
// kernel: ffn_apply.1
= control target key start
LH: loop header
LB: loop body
LE: loop exit
PB: predicated region body
PF: predicated region fallthrough
CT: control target
= control target key end

     0   :  { %s1205_s0 = inlined_call_operand.vmem [shape: f32[16,128], index: 0, kind: input, shape index: {}]   ;;  %s1206_s1 = inlined_call_operand.hbm [shape: f32[128,384], index: 1, kind: input, shape index: {}]   ;;  %s1207_s2 = inlined_call_operand.vmem [shape: f32[1,384], index: 2, kind: input, shape index: {}]   ;;  %s1208_s3 = inlined_call_operand.hbm [shape: f32[384,128], index: 3, kind: input, shape index: {}]   ;;  %s1209_s4 = inlined_call_operand.vmem [shape: f32[1,128], index: 4, kind: input, shape index: {}]   ;;  %s1210_s5 = inlined_call_operand.vmem [shape: f32[16,128], index: 5, kind: output, shape index: {}]  }
   0x1   :  { %1211 = sst [smem:[#allocation9_spill]] %s1206_s1 }
   0x2   :  { %10 = vsyncpa [#allocation4], 0 }
   0x3   :  { %12 = vsyncpa [#allocation4 + $0x1], 0 }
   0x4   :  { %13 = vsyncpa [#allocation6], 0 }
   0x5   :  { %15 = vsyncpa [#allocation6 + $0x1], 0  ;;  %s1015_s18 = smov 0   ;;  %s1017_s19 = smov 0  }
   0x6   :  { %s1019_s20 = smov 0   ;;  %s1021_s21 = smov 0  }
   0x7   :  { %s1023_s22 = smov 0   ;;  %s1025_s23 = smov 0  }
   0x8 LB: > { %s676_s24 = sadd.s32 4294967295, %s977_s23   ;;  %s30_s25 = sadd.s32 1, %s973_s22  ;;  %s977_s23 = sphi %s1025_s23, %s21_s23   ;;  %s973_s22 = sphi %s1023_s22, %s1221_s22   ;;  %s969_s21 = sphi %s1021_s21, %s1220_s21   ;;  %s965_s20 = sphi %s1019_s20, %s1219_s20   ;;  %s961_s19 = sphi %s1017_s19, %s1218_s19   ;;  %s957_s18 = sphi %s1015_s18, %s1217_s18  }
   0x9   : > { %p31_p0 = scmp.ge.s32.totalorder %s30_s25, 3  ;;  %s66_s26 = sadd.s32 1, %s965_s20 }
   0xa   : > { %p73_p1 = scmp.ne.s32.totalorder %s965_s20, %s961_s19  ;;  %p74_p2 = scmp.eq.s32.totalorder %s977_s23, 0 }
   0xb   : > { %s1223_s25 = smov (%p31_p0, %s30_s25), 0  ;;  %p79_p4 = scmp.ne.s32.totalorder %s961_s19, %s957_s18 }
   0xc   : > { %p1051_p3 = por %p74_p2, %p73_p1  ;;  %s63_s28 = ssub.s32 %s973_s22, %s1223_s25 }
   0xd   : > { %p80_p5 = scmp.eq.s32.totalorder %s676_s24, 0  ;;  %p64_p6 = scmp.eq.s32.totalorder %s63_s28, 0 }
   0xe   : > { %p814_p8 = scmp.lt.s32.totalorder %s977_s23, 3  ;;  %s1067_s6 = sand.u32 1, %s965_s20  }
   0xf   : > { %p1058_p7 = por %p80_p5, %p79_p4  ;;  %s681_s7 = sshll.u32 %s973_s22, 7 }
  0x10   : > { %s1064_s30 = scalar_select %p64_p6, %s965_s20, %s66_s26  }
  0x11   : > { %s680_s8 = sshll.u32 %s1067_s6, 7  ;;  %s1214_s1 = sld [smem:[#allocation9_spill]] }
  0x12   : > { %s218_s12 = scalar_lea.vmem [#allocation3], %s680_s8  ;;  %p1078_p9 = pnand %p814_p8, %p1051_p3 }
  0x13   : > { %s224_s13 = sshll.u32 %s218_s12, 4  ;;  %p685_p10 = scmp.ge.s32.totalorder %s977_s23, 1  ;;  %s225_s13 = int_to_ptr.vmem [resolvable:$true] %s224_s13 }
  0x14   : > { %s215_s15 = scalar_lea.sflag [#allocation4], %s1067_s6  ;;  %p869_p11 = pneg %p1078_p9 }
  0x15   : > { %s880_s16 = scalar_lea.vmem %s225_s13, 2048  ;;  %s979_s17 = smov [#allocation3]  }
  0x16   : > { %p881_p12 = scmp.ne.s32.totalorder %s225_s13, %s880_s16  ;;  %s885_s18 = sshll.u32 %s979_s17, 4  ;;  %s886_s18 = int_to_ptr.vmem [resolvable:$false] %s885_s18 }
  0x17   : > { %s223_s11 = scalar_lea.hbm %s1214_s1, %s681_s7  ;;  %s887_s24 = scalar_lea.vmem %s886_s18, 4096 }
  0x18   : > { %p883_p13 = pnand %p881_p12, %p869_p11  ;;  %p888_p1 = scmp.lt.s32.totalorder %s225_s13, %s886_s18 }
  0x19   : > { %p889_p2 = scmp.lt.s32.totalorder %s887_s24, %s880_s16 }
  0x1a   : > { %p884_p0 = pneg %p883_p13 }
  0x1b   : > { %p890_p3 = por %p889_p2, %p888_p1 }
  0x1d   : > { %p891_p4 = pnand %p890_p3, %p884_p0 }
  0x1f   : > { %894 = shalt.err (!%p891_p4)
}
  0x20   : > { %s980_s26 = smov 384   ;;  %s981_s27 = smov 128  }
  0x21   : > { %s982_s28 = smov 8   ;;  %p259_p5 = scmp.lt.s32.totalorder %s977_s23, 4 }
  0x22   : > { %810 = dma.hbm_to_vmem [thread:$0]  (!%p1078_p9), %s223_s11, 2048, %s225_s13, %s215_s15, %s980_s26, %s981_s27, %s982_s28  }
  0x23   : > { %s696_s7 = sshll.u32 %s973_s22, 11  ;;  %p1095_p6 = pnand %p685_p10, %p259_p5 }
  0x24   : > { %s250_s16 = scalar_lea.hbm %s1208_s3, %s696_s7  ;;  %s244_s17 = scalar_lea.vmem [#allocation5], %s680_s8 }
  0x25   : > { %s251_s18 = sshll.u32 %s244_s17, 4  ;;  %s241_s24 = scalar_lea.sflag [#allocation6], %s1067_s6  ;;  %s252_s18 = int_to_ptr.vmem [resolvable:$true] %s251_s18 }
  0x26   : > { %s908_s1 = scalar_lea.vmem %s252_s18, 2048  ;;  %s983_s11 = smov [#allocation5]  }
  0x27   : > { %p909_p8 = scmp.ne.s32.totalorder %s252_s18, %s908_s1  ;;  %s913_s13 = sshll.u32 %s983_s11, 4  ;;  %s914_s13 = int_to_ptr.vmem [resolvable:$false] %s913_s13 }
  0x28   : > { %s915_s15 = scalar_lea.vmem %s914_s13, 4096  ;;  %p916_p10 = scmp.lt.s32.totalorder %s252_s18, %s914_s13 }
  0x29   : > { %p911_p12 = pnand %p909_p8, %p869_p11  ;;  %p917_p0 = scmp.lt.s32.totalorder %s915_s15, %s908_s1 }
  0x2b   : > { %p912_p13 = pneg %p911_p12  ;;  %p918_p1 = por %p917_p0, %p916_p10 }
  0x2d   : > { %p919_p2 = pnand %p918_p1, %p912_p13 }
  0x2f   : > { %922 = shalt.err (!%p919_p2)
}
  0x30   : > { %813 = dma.hbm_to_vmem [thread:$0]  (!%p1078_p9), %s250_s16, 2048, %s252_s18, %s241_s24, %s981_s27, %s981_s27, %s982_s28  }
  0x31   : > { %263 = sbr.rel (%p1095_p6) target bundleno = 508 (0x1fc), region = 40  ;;  %s265_s6 = sand.u32 (!%p1095_p6), 1, %s961_s19  }
  0x32   : > { %s686_s8 = sshll.u32 (!%p1095_p6), %s265_s6, 7  ;;  %s266_s26 = scalar_lea.sflag (!%p1095_p6), [#allocation4], %s265_s6 }
  0x33   : > { %s1113_s7 = scalar_lea.vmem (!%p1095_p6), [#allocation3], %s686_s8 }
  0x36   : > { %948 = dma.done.wait (%p1058_p7), %s266_s26, 2048  }
  0x37   : > { %950 = vsyncadd (%p1058_p7), %s266_s26, 4294965248  ;;  %s275_s1 = scalar_lea.sflag [#allocation6], %s265_s6  ;;  %s1119_s10 = scalar_lea.vmem [#allocation5], %s686_s8 }
  0x38   : > { %952 = dma.done.wait (%p1058_p7), %s275_s1, 2048  }
  0x39   : > { %954 = vsyncadd (%p1058_p7), %s275_s1, 4294965248  ;;  %p324_p9 = scmp.lt.s32.totalorder %s969_s21, 2  ;;  %p688_p11 = scmp.ne.s32.totalorder %s969_s21, 0 }
  0x3b   : > { %s1127_s14 = scalar_select %p324_p9, %s969_s21, 2 }
  0x3c   : > { %337 = sbr.rel (%p688_p11) target bundleno = 67 (0x43), region = 52 }
  0x3d   : > { %s326_s9 = scalar_lea.vmem %s1207_s2, %s1127_s14 }
  0x41   : > { %v984_v0 = vmov 0.0  }
  0x42   : > { %338 = vst [vmem:[#allocation2] sm:$0xff] %v984_v0  ;;  %339 = vst [vmem:[#allocation2 + $0x8] sm:$0xff] %v984_v0 }
  0x43 PF: > { %v357_v1 = vld [vmem:[%s1113_s7 + $0x78] sm:$0xff]  ;;  %v356_v2 = vld [vmem:[%s1113_s7 + $0x70] sm:$0xff]  ;;  %v355_v3 = vld [vmem:[%s1113_s7 + $0x68] sm:$0xff]  ;;  %p690_p7 = scmp.ne.s32.totalorder %s969_s21, 2 }
  0x44   : > { %733 = vmatprep.subr.mxu0 %v357_v1  ;;  %v354_v4 = vld [vmem:[%s1113_s7 + $0x60] sm:$0xff]  ;;  %v340_v5 = vld [vmem:[%s1205_s0] sm:$0xff]  ;;  %v353_v6 = vld [vmem:[%s1113_s7 + $0x58] sm:$0xff] }
  0x45   : > { %734 = vmatpush3.msra.mxu0 %v357_v1  ;;  %765 = vmatprep.mubr.f32.mxu0 %v340_v5  ;;  %v459_v7 = vld [vmem:[%s1119_s10 + $0x78] sm:$0xff]  ;;  %v458_v8 = vld [vmem:[%s1119_s10 + $0x70] sm:$0xff]  ;;  %v457_v10 = vld [vmem:[%s1119_s10 + $0x68] sm:$0xff] }
  0x46   : > { %735 = vmatprep.subr.mxu0 %v356_v2  ;;  %768 = vmatprep.subr.mxu1 %v459_v7  ;;  %v352_v9 = vld [vmem:[%s1113_s7 + $0x50] sm:$0xff]  ;;  %v351_v11 = vld [vmem:[%s1113_s7 + $0x48] sm:$0xff]  ;;  %v456_v12 = vld [vmem:[%s1119_s10 + $0x60] sm:$0xff] }
  0x47   : > { %736 = vmatpush3.msra.mxu0 %v356_v2  ;;  %769 = vmatpush3.msra.mxu1 %v459_v7  ;;  %v350_v13 = vld [vmem:[%s1113_s7 + $0x40] sm:$0xff]  ;;  %v455_v14 = vld [vmem:[%s1119_s10 + $0x58] sm:$0xff]  ;;  %v454_v16 = vld [vmem:[%s1119_s10 + $0x50] sm:$0xff] }
  0x48   : > { %737 = vmatprep.subr.mxu0 %v355_v3  ;;  %770 = vmatprep.subr.mxu1 %v458_v8  ;;  %v349_v15 = vld [vmem:[%s1113_s7 + $0x38] sm:$0xff]  ;;  %v348_v17 = vld [vmem:[%s1113_s7 + $0x30] sm:$0xff]  ;;  %v453_v18 = vld [vmem:[%s1119_s10 + $0x48] sm:$0xff] }
  0x49   : > { %738 = vmatpush3.msra.mxu0 %v355_v3  ;;  %771 = vmatpush3.msra.mxu1 %v458_v8  ;;  %v347_v19 = vld [vmem:[%s1113_s7 + $0x28] sm:$0xff]  ;;  %v452_v20 = vld [vmem:[%s1119_s10 + $0x40] sm:$0xff]  ;;  %v451_v22 = vld [vmem:[%s1119_s10 + $0x38] sm:$0xff] }
  0x4a   : > { %739 = vmatprep.subr.mxu0 %v354_v4  ;;  %772 = vmatprep.subr.mxu1 %v457_v10  ;;  %v346_v21 = vld [vmem:[%s1113_s7 + $0x20] sm:$0xff]  ;;  %v345_v23 = vld [vmem:[%s1113_s7 + $0x18] sm:$0xff]  ;;  %v450_v24 = vld [vmem:[%s1119_s10 + $0x30] sm:$0xff] }
  0x4b   : > { %740 = vmatpush3.msra.mxu0 %v354_v4  ;;  %773 = vmatpush3.msra.mxu1 %v457_v10  ;;  %v344_v25 = vld [vmem:[%s1113_s7 + $0x10] sm:$0xff]  ;;  %v449_v26 = vld [vmem:[%s1119_s10 + $0x28] sm:$0xff]  ;;  %v448_v28 = vld [vmem:[%s1119_s10 + $0x20] sm:$0xff] }
  0x4c   : > { %741 = vmatprep.subr.mxu0 %v353_v6  ;;  %774 = vmatprep.subr.mxu1 %v456_v12  ;;  %v343_v27 = vld [vmem:[%s1113_s7 + $0x8] sm:$0xff]  ;;  %v342_v29 = vld [vmem:[%s1113_s7] sm:$0xff]  ;;  %v341_v30 = vld [vmem:[%s1205_s0 + $0x8] sm:$0xff] }
  0x4d   : > { %742 = vmatpush3.msra.mxu0 %v353_v6  ;;  %775 = vmatpush3.msra.mxu1 %v456_v12  ;;  %v447_v31 = vld [vmem:[%s1119_s10 + $0x18] sm:$0xff]  ;;  %v446_v32 = vld [vmem:[%s1119_s10 + $0x10] sm:$0xff]  ;;  %v445_v33 = vld [vmem:[%s1119_s10 + $0x8] sm:$0xff] }
  0x4e   : > { %743 = vmatprep.subr.mxu0 %v352_v9  ;;  %776 = vmatprep.subr.mxu1 %v455_v14  ;;  %v444_v34 = vld [vmem:[%s1119_s10] sm:$0xff]  ;;  %v689_v35 = vld [vmem:[%s326_s9] ss:$0 sm:$0xff]  ;;  %v443_v42 = vld [vmem:[#allocation2 + $0x8] sm:$0xff] }
  0x4f   : > { %744 = vmatpush3.msra.mxu0 %v352_v9  ;;  %777 = vmatpush3.msra.mxu1 %v455_v14  ;;  %v442_v44 = vld [vmem:[#allocation2] sm:$0xff] }
  0x50   : > { %745 = vmatprep.subr.mxu0 %v351_v11  ;;  %778 = vmatprep.subr.mxu1 %v454_v16 }
  0x51   : > { %746 = vmatpush3.msra.mxu0 %v351_v11  ;;  %779 = vmatpush3.msra.mxu1 %v454_v16 }
  0x52   : > { %747 = vmatprep.subr.mxu0 %v350_v13  ;;  %780 = vmatprep.subr.mxu1 %v453_v18 }
  0x53   : > { %748 = vmatpush3.msra.mxu0 %v350_v13  ;;  %781 = vmatpush3.msra.mxu1 %v453_v18 }
  0x54   : > { %749 = vmatprep.subr.mxu0 %v349_v15  ;;  %782 = vmatprep.subr.mxu1 %v452_v20 }
  0x55   : > { %750 = vmatpush3.msra.mxu0 %v349_v15  ;;  %783 = vmatpush3.msra.mxu1 %v452_v20 }
  0x56   : > { %751 = vmatprep.subr.mxu0 %v348_v17  ;;  %784 = vmatprep.subr.mxu1 %v451_v22 }
  0x57   : > { %752 = vmatpush3.msra.mxu0 %v348_v17  ;;  %785 = vmatpush3.msra.mxu1 %v451_v22 }
  0x58   : > { %753 = vmatprep.subr.mxu0 %v347_v19  ;;  %786 = vmatprep.subr.mxu1 %v450_v24 }
  0x59   : > { %754 = vmatpush3.msra.mxu0 %v347_v19  ;;  %787 = vmatpush3.msra.mxu1 %v450_v24 }
  0x5a   : > { %755 = vmatprep.subr.mxu0 %v346_v21  ;;  %788 = vmatprep.subr.mxu1 %v449_v26 }
  0x5b   : > { %756 = vmatpush3.msra.mxu0 %v346_v21  ;;  %789 = vmatpush3.msra.mxu1 %v449_v26 }
  0x5c   : > { %757 = vmatprep.subr.mxu0 %v345_v23  ;;  %790 = vmatprep.subr.mxu1 %v448_v28 }
  0x5d   : > { %758 = vmatpush3.msra.mxu0 %v345_v23  ;;  %791 = vmatpush3.msra.mxu1 %v448_v28 }
  0x5e   : > { %759 = vmatprep.subr.mxu0 %v344_v25  ;;  %792 = vmatprep.subr.mxu1 %v447_v31 }
  0x5f   : > { %760 = vmatpush3.msra.mxu0 %v344_v25  ;;  %793 = vmatpush3.msra.mxu1 %v447_v31 }
  0x60   : > { %761 = vmatprep.subr.mxu0 %v343_v27  ;;  %794 = vmatprep.subr.mxu1 %v446_v32 }
  0x61   : > { %762 = vmatpush3.msra.mxu0 %v343_v27  ;;  %795 = vmatpush3.msra.mxu1 %v446_v32 }
  0x62   : > { %763 = vmatprep.subr.mxu0 %v342_v29  ;;  %796 = vmatprep.subr.mxu1 %v445_v33 }
  0x63   : > { %764 = vmatpush3.msra.mxu0 %v342_v29  ;;  %797 = vmatpush3.msra.mxu1 %v445_v33 }
  0x64   : > { %766 = vmatmul.mubr.f32.vlgmr.msra.gmra.mxu0 %v341_v30  ;;  %798 = vmatprep.subr.mxu1 %v444_v34 }
  0x65   : > { %799 = vmatpush3.msra.mxu1 %v444_v34 }
 0x124   : > { %v767_v36 = vpop.f32.mrf.mxu0 }
 0x125   : > { %v437_v37 = vadd.f32 %v767_v36, %v689_v35 }
 0x126   : > { %v431_v38 = vpop.f32.mrf.mxu0 }
 0x127   : > { %v432_v39 = vadd.f32 %v689_v35, %v431_v38  ;;  %v441_v41 = vmax.f32 %v437_v37, 0.0 }
 0x129   : > { %v440_v40 = vmax.f32 %v432_v39, 0.0 }
 0x12b   : > { %800 = vmatprep.mubr.f32.mxu1 %v440_v40 }
 0x12c   : > { %801 = vmatmul.mubr.f32.vlgmr.msra.gmra.mxu1 %v441_v41 }
 0x1ec   : > { %v802_v43 = vpop.f32.mrf.mxu1 }
 0x1ed   : > { %v536_v45 = vadd.f32 %v802_v43, %v443_v42  ;;  %542 = sbr.rel (%p690_p7) target bundleno = 508 (0x1fc), region = 56 }
 0x1ee   : > { %v526_v46 = vpop.f32.mrf.mxu1 }
 0x1ef   : > { %538 = vst [vmem:[#allocation2 + $0x8] sm:$0xff] %v536_v45  ;;  %v535_v47 = vadd.f32 %v526_v46, %v442_v44 }
 0x1f1   : > { %537 = vst [vmem:[#allocation2] sm:$0xff] %v535_v47 }
 0x1f2   : > { %v691_v49 = vld [vmem:[%s1209_s4] ss:$0 sm:$0xff] }
 0x1f6   : > { %v544_v50 = vld [vmem:[#allocation2 + $0x8] sm:$0xff] }
 0x1f7   : > { %v553_v52 = vadd.f32 %v691_v49, %v544_v50 }
 0x1f8   : > { %v543_v48 = vld [vmem:[#allocation2] sm:$0xff] }
 0x1f9   : > { %v552_v51 = vadd.f32 %v691_v49, %v543_v48  ;;  %555 = vst [vmem:[%s1210_s5 + $0x8] sm:$0xff] %v553_v52 }
 0x1fb   : > { %554 = vst [vmem:[%s1210_s5] sm:$0xff] %v552_v51 }
 0x1fc PF: > { %s21_s23 = sadd.s32 1, %s977_s23   ;;  %s1217_s18 = smov %s961_s19 }
 0x1fd   : > { %p18_p3 = scmp.ge.s32.totalorder %s21_s23, 5   ;;  %s1218_s19 = smov %s965_s20 }
 0x1fe   : > { %s1219_s20 = smov %s1064_s30  ;;  %s1220_s21 = smov %s973_s22 }
 0x1ff   : > { %s1221_s22 = smov %s1223_s25  ;;  %20 = sbr.rel (!%p18_p3) target bundleno = 8 (0x8), region = 107 }
 0x204   :  { %578 = vsyncpa [#allocation4], 1 }
 0x205   :  { %580 = vsyncpa [#allocation4 + $0x1], 1 }
 0x206   :  { %581 = vsyncpa [#allocation6], 1 }
 0x207   :  { %583 = vsyncpa [#allocation6 + $0x1], 1 }

</bundles_post_ra>
